<compile_context>
chip_gen: v5e
topology: v5e:2x2
jax: 0.10.0
libtpu: 0.0.40
codegen_flags: <defaults>
</compile_context>

<pallas_src>
import math
from functools import lru_cache

import jax
import jax.numpy as jnp
from jax.experimental import pallas as pl
from jax.experimental.pallas import tpu as pltpu

LANE = 128
# Minimum sublane (second-to-last) tiling per element width so loads/stores
# stay full-vreg: f32 packs 8 rows/vreg, bf16 16, int8/fp8 32.
_MIN_SUBLANE = {4: 8, 2: 16, 1: 32}
# Sub-byte / packed dtypes the copy kernel does not handle; reshape on them is
# metadata-only anyway, so they go straight to jnp.reshape.
_SUB_BYTE_TAGS = ("int4", "uint4", "float4", "e2m1", "e8m0")


def _copy_kernel(x_ref, o_ref):
    # Identity copy of the current (block_rows, width) tile.
    o_ref[...] = x_ref[...]


def _resolve_out_shape(out_shape, total):
    """Mimic torch reshape's -1 inference (with divisibility checks)."""
    if isinstance(out_shape, int):
        out_shape = (out_shape,)
    out_shape = tuple(int(d) for d in out_shape)
    if out_shape.count(-1) > 1:
        raise ValueError("only one dimension can be inferred (-1)")
    if -1 in out_shape:
        known = math.prod(d for d in out_shape if d != -1)
        if known == 0 or total % known != 0:
            raise ValueError(f"cannot infer -1 in {out_shape} for size {total}")
        out_shape = tuple(total // known if d == -1 else d for d in out_shape)
    if math.prod(out_shape) != total:
        raise ValueError(f"shape {out_shape} incompatible with input size {total}")
    return out_shape


@lru_cache(maxsize=1)
def _chip_tuning():
    """(target_block_bytes, vmem_limit_bytes), tuned per TPU generation."""
    kind = ""
    try:
        kind = jax.devices()[0].device_kind.lower()
    except Exception:
        pass
    if "v7" in kind or "7x" in kind:
        # v7x: ~3.2 TB/s HBM but only 64 MiB physical VMEM per TensorCore.
        # 6 MiB block -> 24 MiB double-buffered footprint, 48 MiB limit.
        return 6 * 1024 * 1024, 48 * 1024 * 1024
    if "v6" in kind:
        # v6e: 128 MiB VMEM, ~1.4 TB/s HBM -> spend VMEM on big blocks.
        return 8 * 1024 * 1024, 64 * 1024 * 1024
    if "v5" in kind:
        # v5e: ~0.8 TB/s HBM; scoped-VMEM default is only 16 MiB -> raise it.
        return 6 * 1024 * 1024, 48 * 1024 * 1024
    # Unknown chip: conservative middle ground.
    return 6 * 1024 * 1024, 48 * 1024 * 1024


def _pick_slab(total):
    """Factor a 128-aligned `total` into a lane-dense (rows, width) slab."""
    for w in (4096, 2048, 1024, 512, 256, 128):
        if total % w == 0:
            return total // w, w
    raise AssertionError("caller guarantees total % 128 == 0")


def pallas_reshape(x, out_shape, *, prefer_kernel=True):
    """Equivalent of Reshape(out_shape)(x).

    prefer_kernel=False (or any case the copy kernel can't tile cleanly) takes
    the true zero-cost path: reshape on a contiguous row-major array is
    metadata-only, so XLA does it for free.
    """
    total = x.size
    out_shape = _resolve_out_shape(out_shape, total)

    dtype = jnp.dtype(x.dtype)
    itemsize = dtype.itemsize
    sub_byte = any(tag in dtype.name for tag in _SUB_BYTE_TAGS)

    if (not prefer_kernel or total == 0 or total % LANE != 0
            or sub_byte or itemsize not in _MIN_SUBLANE):
        # Ragged / empty / packed-dtype cases: no pad+slice round trip, just
        # the metadata-only XLA reshape.
        return jnp.reshape(x, out_shape)

    min_sublane = _MIN_SUBLANE[itemsize]
    target_block_bytes, vmem_limit_bytes = _chip_tuning()

    rows, width = _pick_slab(total)
    slab = jnp.reshape(x, (rows, width))

    if rows <= min_sublane:
        block_rows = rows  # full-extent dim is always a legal block dim
    else:
        # Dtype-aware block sizing (~target_block_bytes per buffer).
        block_rows = max(min_sublane, target_block_bytes // (width * itemsize))
        block_rows = (block_rows // min_sublane) * min_sublane
        block_rows = min(block_rows, (rows // min_sublane) * min_sublane)
        # Keep >=2 grid steps when possible so both TensorCores on dual-core
        # parts (v7x) issue copies; neutral on single-core v5e/v6e.
        if rows >= 2 * min_sublane:
            half = ((rows // 2) // min_sublane) * min_sublane
            block_rows = min(block_rows, max(half, min_sublane))

    grid = (pl.cdiv(rows, block_rows),)

    out_slab = pl.pallas_call(
        _copy_kernel,
        out_shape=jax.ShapeDtypeStruct((rows, width), x.dtype),
        grid_spec=pltpu.PrefetchScalarGridSpec(
            num_scalar_prefetch=0,
            grid=grid,
            in_specs=[pl.BlockSpec((block_rows, width), lambda i: (i, 0))],
            out_specs=pl.BlockSpec((block_rows, width), lambda i: (i, 0)),
        ),
        compiler_params=pltpu.CompilerParams(
            dimension_semantics=("parallel",),
            vmem_limit_bytes=vmem_limit_bytes,
        ),
        input_output_aliases={0: 0},
    )(slab)

    return jnp.reshape(out_slab, out_shape)


if __name__ == "__main__":
    key = jax.random.PRNGKey(0)
    k1, k2, k3, k4 = jax.random.split(key, 4)

    # 1) NCHW f32 input, flatten non-batch dims (the canonical Reshape use).
    x1 = jax.random.normal(k1, (2, 4, 16, 16), dtype=jnp.float32)
    y1 = pallas_reshape(x1, (2, -1))
    jax.block_until_ready(y1)
    ref1 = x1.reshape((2, 1024))
    assert y1.shape == ref1.shape and y1.dtype == ref1.dtype
    assert bool(jnp.array_equal(y1, ref1))

    # 2) bf16 input (exercises dtype-aware sublane tiling).
    x2 = jax.random.normal(k2, (4, 6, 16), dtype=jnp.bfloat16)
    y2 = pallas_reshape(x2, (-1, 8))
    jax.block_until_ready(y2)
    ref2 = x2.reshape((48, 8))
    assert y2.shape == ref2.shape and y2.dtype == ref2.dtype
    assert bool(jnp.array_equal(y2, ref2))

    # 3) Element count not a multiple of 128 (metadata-only fallback path).
    x3 = jax.random.normal(k3, (3, 5, 7), dtype=jnp.float32)
    y3 = pallas_reshape(x3, (5, 21))
    jax.block_until_ready(y3)
    ref3 = x3.reshape((5, 21))
    assert y3.shape == ref3.shape and y3.dtype == ref3.dtype
    assert bool(jnp.array_equal(y3, ref3))

    # 4) Larger input (exercises the multi-step "parallel" grid + big blocks).
    x4 = jax.random.normal(k4, (64, 256, 128), dtype=jnp.float32)
    y4 = pallas_reshape(x4, (64, -1))
    jax.block_until_ready(y4)
    ref4 = x4.reshape((64, 32768))
    assert y4.shape == ref4.shape and y4.dtype == ref4.dtype
    assert bool(jnp.array_equal(y4, ref4))

    print("KERNEL_OK")
</pallas_src>

<mosaic_0001>
module attributes {stable_mosaic.version = 11 : i64} {
  func.func @_copy_kernel(%arg0: i32, %arg1: memref<1x2048xf32, #tpu.memory_space<vmem>>, %arg2: memref<1x2048xf32, #tpu.memory_space<vmem>>) attributes {dimension_semantics = [#tpu.dimension_semantics<parallel>], iteration_bounds = array<i64: 1>, scalar_prefetch = 0 : i64, scratch_operands = 0 : i64, tpu.core_type = #tpu.core_type<tc>, window_params = [{transform_indices = @transform_0, window_bounds = array<i64: 1, 2048>}, {transform_indices = @transform_1, window_bounds = array<i64: 1, 2048>}]} {
    %c0 = arith.constant 0 : index
    %c0_0 = arith.constant 0 : index
    %0 = vector.load %arg1[%c0, %c0_0] : memref<1x2048xf32, #tpu.memory_space<vmem>>, vector<1x2048xf32>
    %c0_1 = arith.constant 0 : index
    %c0_2 = arith.constant 0 : index
    %1 = vector.load %arg2[%c0_1, %c0_2] : memref<1x2048xf32, #tpu.memory_space<vmem>>, vector<1x2048xf32>
    tpu.vector_store %arg2[%c0_1, %c0_2], %0 {strides = array<i32>} : memref<1x2048xf32, #tpu.memory_space<vmem>>, vector<1x2048xf32>,
    return
  }
  func.func @transform_0(%arg0: i32) -> (i32, i32) {
    %c0_i32 = arith.constant 0 : i32
    %c0_i32_0 = arith.constant 0 : i32
    return %arg0, %c0_i32 : i32, i32
  }
  func.func @transform_1(%arg0: i32) -> (i32, i32) {
    %c0_i32 = arith.constant 0 : i32
    %c0_i32_0 = arith.constant 0 : i32
    return %arg0, %c0_i32 : i32, i32
  }
}

</mosaic_0001>

<bundles_post_ra>
// kernel: tpu_custom_call.1
= control target key start
LH: loop header
LB: loop body
LE: loop exit
PB: predicated region body
PF: predicated region fallthrough
CT: control target
= control target key end

     0   :  { %6 = vsyncpa [#allocation3], 0  ;;  %s116_s0 = inlined_call_operand.hbm [shape: f32[1,2048], index: 0, kind: input, shape index: {}, may-alias: {0,1}]   ;;  %s117_s1 = inlined_call_operand.hbm [shape: f32[1,2048], index: 1, kind: output, shape index: {}, may-alias: {0,1}]  }
   0x1   :  { %7 = vsyncpa [#allocation4], 0  ;;  %s13_s8 = sshll.u32 %s116_s0, 4  ;;  %s98_s9 = smov [#allocation2]   ;;  %s14_s8 = int_to_ptr.hbm [resolvable:$true] %s13_s8 }
   0x2   :  { %s15_s10 = sshll.u32 %s98_s9, 4  ;;  %s16_s10 = int_to_ptr.vmem [resolvable:$true] %s15_s10 }
   0x3   :  { %18 = dma.hbm_to_vmem [thread:$0]  %s14_s8, 256, %s16_s10, [#allocation3]  }
   0x4   :  { %94 = dma.done.wait [#allocation3], 256  }
   0x5   :  { %95 = vsyncadd [#allocation3], 4294967040  ;;  %s99_s11 = smov [#allocation5]   ;;  %s34_s15 = sshll.u32 %s117_s1, 4  ;;  %v23_v0 = vld [vmem:[#allocation2] sm:$0xff]  ;;  %v24_v1 = vld [vmem:[#allocation2 + $0x8] sm:$0xff]  ;;  %s35_s15 = int_to_ptr.hbm [resolvable:$true] %s34_s15 }
   0x6   :  { %s32_s12 = sshll.u32 %s99_s11, 4  ;;  %25 = vst [vmem:[#allocation5] sm:$0xff] %v23_v0  ;;  %s33_s12 = int_to_ptr.vmem [resolvable:$true] %s32_s12 }
   0x7   :  { %26 = vst [vmem:[#allocation5 + $0x8] sm:$0xff] %v24_v1 }
   0x8   :  { %37 = dma.vmem_to_hbm [thread:$0]  %s33_s12, 256, %s35_s15, [#allocation4]  }
   0x9   :  { %96 = dma.done.wait [#allocation4], 256  }
   0xa   :  { %97 = vsyncadd [#allocation4], 4294967040 }
   0xb   :  { %42 = vsyncpa [#allocation3], 1 }
   0xc   :  { %43 = vsyncpa [#allocation4], 1 }

</bundles_post_ra>
